<compile_context>
chip_gen: v7x
topology: tpu7x:2x2x1
jax: 0.10.0
libtpu: 0.0.40
codegen_flags: <defaults>
</compile_context>

<pallas_src>
import math

import jax
import jax.numpy as jnp
from jax.experimental import pallas as pl
from jax.experimental.pallas import tpu as pltpu

_SQRT_2_OVER_PI = math.sqrt(2.0 / math.pi)
_GELU_K = 0.044715


def _gelu_kernel(x_ref, o_ref):
    # 0.5*x*(1+tanh(c*(x + k*x^3)))  ==  x * sigmoid((2c*x)*(1 + k*x*x))
    x = x_ref[...]
    xf = x.astype(jnp.float32)          # opmath: compute half dtypes in f32
    z = (2.0 * _SQRT_2_OVER_PI * xf) * (1.0 + _GELU_K * xf * xf)
    o_ref[...] = (xf * jax.nn.sigmoid(z)).astype(o_ref.dtype)


def _cdiv(a, b):
    return -(-a // b)


def _sublane_pack(dtype):
    # packed-sublane tile: 8 rows for 32-bit, 16 for 16-bit, 32 for 8-bit dtypes
    itemsize = jnp.dtype(dtype).itemsize
    return max(8, 32 // itemsize)


def _device_params():
    """(target_block_bytes, vmem_limit_bytes, min_grid_steps) per TPU generation."""
    kind = ""
    try:
        kind = jax.devices()[0].device_kind.lower()
    except Exception:
        pass
    if "7" in kind:
        # v7x: 2 TCs/chip, 64 MiB VMEM/TC, ~3.2 TB/s HBM -> big blocks, split grid.
        return 8 * 1024 * 1024, 48 * 1024 * 1024, 8
    if "v6" in kind or "6e" in kind:
        # v6e: 1 TC, 128 MiB VMEM, ~1.4 TB/s HBM.
        return 4 * 1024 * 1024, 64 * 1024 * 1024, 1
    if "v5" in kind:
        # v5e: scoped-VMEM default is only 16 MiB -> raise it explicitly.
        return 4 * 1024 * 1024, 64 * 1024 * 1024, 1
    # Unknown generation: conservative (fits every scoped-VMEM default).
    return 2 * 1024 * 1024, 32 * 1024 * 1024, 1


def _pick_width(n):
    """Widest lane-dense view (last dim) that lets us reshape with no copy."""
    for w in (1024, 512, 256, 128):
        if n % w == 0 and (n // w) % 8 == 0:
            return w
    for w in (1024, 512, 256, 128):
        if n % w == 0:
            return w
    return None


def _pick_tile_rows(rows, width, dtype, target_block_bytes, min_steps):
    pack = _sublane_pack(dtype)
    itemsize = jnp.dtype(dtype).itemsize
    target_rows = max(pack, target_block_bytes // (width * itemsize))
    tr = max(pack, (target_rows // pack) * pack)
    # Only force a multi-step grid where it feeds a second TensorCore (v7x).
    if min_steps > 1 and rows > min_steps * pack:
        tr = min(tr, max(pack, _cdiv(_cdiv(rows, min_steps), pack) * pack))
    tr = min(tr, _cdiv(rows, pack) * pack)
    tr = max(tr, pack)
    if tr >= rows:
        return rows  # single full-extent block: always a legal block shape
    return tr


def _run_gelu_2d(x2d, tile_rows, vmem_limit_bytes):
    rows, width = x2d.shape
    n = rows * width
    itemsize = jnp.dtype(x2d.dtype).itemsize
    grid = (pl.cdiv(rows, tile_rows),)
    return pl.pallas_call(
        _gelu_kernel,
        out_shape=jax.ShapeDtypeStruct((rows, width), x2d.dtype),
        grid_spec=pltpu.PrefetchScalarGridSpec(
            num_scalar_prefetch=0,
            grid=grid,
            in_specs=[pl.BlockSpec((tile_rows, width), lambda i: (i, 0))],
            out_specs=pl.BlockSpec((tile_rows, width), lambda i: (i, 0)),
        ),
        compiler_params=pltpu.CompilerParams(
            dimension_semantics=("parallel",),
            vmem_limit_bytes=vmem_limit_bytes,
        ),
        cost_estimate=pl.CostEstimate(
            flops=8 * n,
            transcendentals=n,
            bytes_accessed=2 * n * itemsize,
        ),
    )(x2d)


def gelu_pallas(x):
    """Elementwise tanh-approx GELU via Pallas. Any shape, any float dtype."""
    orig_shape = x.shape
    n = x.size
    if n == 0:
        return x

    target_block_bytes, vmem_limit, min_steps = _device_params()

    width = _pick_width(n)
    if width is not None:
        # Fast path: pure reshape (no pad, no slice) to a wide lane-dense slab.
        rows = n // width
        x2d = x.reshape(rows, width)
        tr = _pick_tile_rows(rows, width, x.dtype, target_block_bytes, min_steps)
        return _run_gelu_2d(x2d, tr, vmem_limit).reshape(orig_shape)

    # Ragged flat length (not a multiple of 128): run the aligned prefix through
    # the normal path and pad only the tiny tail (< pack*128 elements).
    pack = _sublane_pack(x.dtype)
    chunk = pack * 128
    x_flat = jnp.ravel(x)
    n_main = (n // chunk) * chunk
    pieces = []
    if n_main:
        rows = n_main // 128
        tr = _pick_tile_rows(rows, 128, x.dtype, target_block_bytes, min_steps)
        main = _run_gelu_2d(x_flat[:n_main].reshape(rows, 128), tr, vmem_limit)
        pieces.append(main.reshape(-1))
    n_tail = n - n_main
    if n_tail:
        tail = jnp.pad(x_flat[n_main:], (0, chunk - n_tail)).reshape(pack, 128)
        tail_out = _run_gelu_2d(tail, pack, vmem_limit)
        pieces.append(tail_out.reshape(-1)[:n_tail])
    out = pieces[0] if len(pieces) == 1 else jnp.concatenate(pieces)
    return out.reshape(orig_shape)


def gelu_ref(x):
    c = jnp.asarray(math.sqrt(2.0 / math.pi), dtype=x.dtype)
    return 0.5 * x * (1.0 + jnp.tanh(c * (x + 0.044715 * jnp.power(x, 3))))


if __name__ == "__main__":
    key = jax.random.PRNGKey(0)
    x = jax.random.normal(key, (2, 4, 16, 16), dtype=jnp.float32)
    out = jax.block_until_ready(gelu_pallas(x))
    ref = gelu_ref(x)
    assert out.shape == x.shape and out.dtype == x.dtype
    assert jnp.allclose(out, ref, atol=1e-5, rtol=1e-5)

    # rows < sublane pack (5, 128): full-extent block path.
    x2 = jax.random.normal(jax.random.PRNGKey(1), (5, 128), dtype=jnp.float32)
    out2 = jax.block_until_ready(gelu_pallas(x2))
    assert jnp.allclose(out2, gelu_ref(x2), atol=1e-5, rtol=1e-5)

    # Ragged flat length (3000 elements): aligned prefix + tiny padded tail.
    x3 = jax.random.normal(jax.random.PRNGKey(2), (3, 1000), dtype=jnp.float32)
    out3 = jax.block_until_ready(gelu_pallas(x3))
    assert jnp.allclose(out3, gelu_ref(x3), atol=1e-5, rtol=1e-5)

    # bf16: math runs internally in f32 (PyTorch opmath), result cast back.
    xb = jax.random.normal(jax.random.PRNGKey(3), (2, 4, 16, 16), dtype=jnp.bfloat16)
    outb = jax.block_until_ready(gelu_pallas(xb))
    refb = gelu_ref(xb.astype(jnp.float32)).astype(jnp.bfloat16)
    assert outb.dtype == jnp.bfloat16
    assert jnp.allclose(outb.astype(jnp.float32), refb.astype(jnp.float32),
                        atol=1e-2, rtol=1e-2)

    print("KERNEL_OK")
</pallas_src>

<mosaic_0001>
module attributes {stable_mosaic.version = 11 : i64} {
  func.func @_gelu_kernel(%arg0: i32, %arg1: memref<8x256xf32, #tpu.memory_space<vmem>>, %arg2: memref<8x256xf32, #tpu.memory_space<vmem>>) attributes {dimension_semantics = [#tpu.dimension_semantics<parallel>], iteration_bounds = array<i64: 1>, scalar_prefetch = 0 : i64, scratch_operands = 0 : i64, tpu.core_type = #tpu.core_type<tc>, window_params = [{transform_indices = @transform_0, window_bounds = array<i64: 8, 256>}, {transform_indices = @transform_1, window_bounds = array<i64: 8, 256>}]} {
    %c0 = arith.constant 0 : index
    %c0_0 = arith.constant 0 : index
    %0 = vector.load %arg1[%c0, %c0_0] : memref<8x256xf32, #tpu.memory_space<vmem>>, vector<8x256xf32>
    %cst = arith.constant 1.59576917 : f32
    %1 = vector.broadcast %cst : f32 to vector<8x256xf32>
    %2 = arith.mulf %1, %0 : vector<8x256xf32>
    %cst_1 = arith.constant 4.471500e-02 : f32
    %3 = vector.broadcast %cst_1 : f32 to vector<8x256xf32>
    %4 = arith.mulf %3, %0 : vector<8x256xf32>
    %5 = arith.mulf %4, %0 : vector<8x256xf32>
    %cst_2 = arith.constant 1.000000e+00 : f32
    %6 = vector.broadcast %cst_2 : f32 to vector<8x256xf32>
    %7 = arith.addf %6, %5 : vector<8x256xf32>
    %8 = arith.mulf %2, %7 : vector<8x256xf32>
    %9 = arith.negf %8 : vector<8x256xf32>
    %10 = math.exp %9 : vector<8x256xf32>
    %cst_3 = arith.constant 1.000000e+00 : f32
    %11 = vector.broadcast %cst_3 : f32 to vector<8x256xf32>
    %12 = arith.addf %11, %10 : vector<8x256xf32>
    %13 = arith.divf %11, %12 : vector<8x256xf32>
    %14 = arith.mulf %0, %13 : vector<8x256xf32>
    %c0_4 = arith.constant 0 : index
    %c0_5 = arith.constant 0 : index
    %15 = vector.load %arg2[%c0_4, %c0_5] : memref<8x256xf32, #tpu.memory_space<vmem>>, vector<8x256xf32>
    tpu.vector_store %arg2[%c0_4, %c0_5], %14 {strides = array<i32>} : memref<8x256xf32, #tpu.memory_space<vmem>>, vector<8x256xf32>,
    return
  }
  func.func @transform_0(%arg0: i32) -> (i32, i32) {
    %c0_i32 = arith.constant 0 : i32
    %c0_i32_0 = arith.constant 0 : i32
    return %arg0, %c0_i32 : i32, i32
  }
  func.func @transform_1(%arg0: i32) -> (i32, i32) {
    %c0_i32 = arith.constant 0 : i32
    %c0_i32_0 = arith.constant 0 : i32
    return %arg0, %c0_i32 : i32, i32
  }
}

</mosaic_0001>

<bundles_post_ra>
// kernel: tpu_custom_call.1
= control target key start
LH: loop header
LB: loop body
LE: loop exit
PB: predicated region body
PF: predicated region fallthrough
CT: control target
= control target key end

     0   :  { %6 = vsyncpa [#allocation3], 0  ;;  %s160_s0 = inlined_call_operand.hbm [shape: f32[8,256], index: 0, kind: input, shape index: {}]   ;;  %s161_s1 = inlined_call_operand.hbm [shape: f32[8,256], index: 1, kind: output, shape index: {}]  }
   0x1   :  { %7 = vsyncpa [#allocation4], 0  ;;  %s124_s6 = smov [#allocation2]   ;;  %s76_s10 = scalar_lea.hbm %s160_s0, 256 }
   0x2   :  { %s14_s7 = sshll.u32 %s124_s6, 4  ;;  %p77_p0 = scmp.ne.s32.totalorder %s160_s0, %s76_s10  ;;  %s15_s7 = int_to_ptr.vmem [resolvable:$true] %s14_s7 }
   0x3   :  { %p80_p1 = scmp.lt.u32.totalorder %s76_s10, %s160_s0 }
   0x5   :  { %p82_p2 = pnand %p80_p1, %p77_p0 }
   0x7   :  { %85 = shalt.err (!%p82_p2)
}
   0x8   :  { %s86_s15 = scalar_lea.vmem %s15_s7, 256  ;;  %p91_p4 = scmp.lt.s32.totalorder %s15_s7, %s15_s7 }
   0x9   :  { %p87_p3 = scmp.ne.s32.totalorder %s15_s7, %s86_s15  ;;  %p92_p5 = scmp.lt.s32.totalorder %s86_s15, %s86_s15 }
   0xb   :  { %p93_p6 = por %p92_p5, %p91_p4 }
   0xd   :  { %p94_p7 = pnand %p93_p6, %p87_p3 }
   0xf   :  { %97 = shalt.err (!%p94_p7)
}
  0x10   :  { %17 = dma.hbm_to_vmem [thread:$0]  %s160_s0, 256, %s15_s7, [#allocation3]  }
  0x11   :  { %120 = dma.done.wait [#allocation3], 256  }
  0x12   :  { %121 = vsyncadd [#allocation3], 4294967040  ;;  %v21_v0 = vld [vmem:[#allocation2] sm:$0xff]  ;;  %v22_v1 = vld [vmem:[#allocation2 + $0x8] sm:$0xff]  ;;  %s125_s0 = smov [#allocation5]  }
  0x13   :  { %v25_v2 = vmul.f32 0.044715, %v21_v0  ;;  %v26_v3 = vmul.f32 0.044715, %v22_v1  ;;  %v23_v4 = vmul.f32 1.5957692, %v21_v0 }
  0x14   :  { %v24_v6 = vmul.f32 1.5957692, %v22_v1  ;;  %s55_s18 = sshll.u32 %s125_s0, 4  ;;  %s56_s18 = int_to_ptr.vmem [resolvable:$true] %s55_s18 }
  0x15   :  { %v27_v5 = vmul.f32 %v25_v2, %v21_v0  ;;  %v28_v7 = vmul.f32 %v26_v3, %v22_v1  ;;  %s98_s19 = scalar_lea.vmem %s56_s18, 256  ;;  %p103_p9 = scmp.lt.s32.totalorder %s56_s18, %s56_s18 }
  0x16   :  { %p99_p8 = scmp.ne.s32.totalorder %s56_s18, %s98_s19  ;;  %p104_p10 = scmp.lt.s32.totalorder %s98_s19, %s98_s19 }
  0x17   :  { %v29_v8 = vadd.f32 1.0, %v27_v5  ;;  %v30_v9 = vadd.f32 1.0, %v28_v7 }
  0x18   :  { %p105_p11 = por %p104_p10, %p103_p9 }
  0x19   :  { %v31_v10 = vmul.f32 %v29_v8, %v23_v4  ;;  %v32_v11 = vmul.f32 %v30_v9, %v24_v6 }
  0x1a   :  { %p106_p12 = pnand %p105_p11, %p99_p8 }
  0x1b   :  { %v64_v12 = vmul.f32 -1.442695, %v31_v10  ;;  %v65_v13 = vmul.f32 -1.442695, %v32_v11 }
  0x1d   :  { %68 = vpow2.f32 %v64_v12 }
  0x1e   :  { %70 = vpow2.f32 %v65_v13 }
  0x27   :  { %v69_v14 = vpop.eup %68 }
  0x28   :  { %v71_v15 = vpop.eup %70  ;;  %v39_v16 = vadd.f32 1.0, %v69_v14 }
  0x29   :  { %v40_v17 = vadd.f32 1.0, %v71_v15 }
  0x2a   :  { %72 = vrcp.f32 %v39_v16 }
  0x2b   :  { %74 = vrcp.f32 %v40_v17 }
  0x34   :  { %v73_v18 = vpop.eup %72 }
  0x35   :  { %v75_v19 = vpop.eup %74  ;;  %v45_v20 = vmul.f32 %v73_v18, %v21_v0 }
  0x36   :  { %v46_v21 = vmul.f32 %v75_v19, %v22_v1 }
  0x37   :  { %47 = vst [vmem:[#allocation5] sm:$0xff] %v45_v20 }
  0x38   :  { %48 = vst [vmem:[#allocation5 + $0x8] sm:$0xff] %v46_v21 }
  0x39   :  { %109 = shalt.err (!%p106_p12)
}
  0x3a   :  { %s110_s22 = scalar_lea.hbm %s161_s1, 256 }
  0x3b   :  { %p111_p13 = scmp.ne.s32.totalorder %s161_s1, %s110_s22  ;;  %p114_p0 = scmp.lt.u32.totalorder %s110_s22, %s161_s1 }
  0x3d   :  { %p116_p1 = pnand %p114_p0, %p111_p13 }
  0x3f   :  { %119 = shalt.err (!%p116_p1)
}
  0x40   :  { %58 = dma.vmem_to_hbm [thread:$0]  %s56_s18, 256, %s161_s1, [#allocation4]  }
  0x41   :  { %122 = dma.done.wait [#allocation4], 256  }
  0x42   :  { %123 = vsyncadd [#allocation4], 4294967040 }
  0x43   :  { %62 = vsyncpa [#allocation3], 1 }
  0x44   :  { %63 = vsyncpa [#allocation4], 1 }

</bundles_post_ra>
